<compile_context>
chip_gen: v7x
topology: tpu7x:2x2x1
jax: 0.10.0
libtpu: 0.0.40
codegen_flags: <defaults>
</compile_context>

<pallas_src>
import functools

import numpy as np
import jax
import jax.numpy as jnp
from jax.experimental import pallas as pl
from jax.experimental.pallas import tpu as pltpu


def _round_up(x, m):
    return ((x + m - 1) // m) * m


def _default_epilogue_dtype(matmul_dtype):
    """bf16 bias+tanh epilogue only where the VPU/EUP is bf16-native (v6e / v7x)."""
    if np.dtype(matmul_dtype) == np.dtype(jnp.float32):
        return jnp.float32
    try:
        kind = jax.devices()[0].device_kind.lower()
    except Exception:
        return jnp.float32
    if ("v6" in kind) or ("v7" in kind) or ("tpu7" in kind):
        return jnp.bfloat16
    return jnp.float32  # v5e and older: no bf16 VPU/EUP -> keep the f32 epilogue


def prepare_mlp_base_params(params, *, matmul_dtype=jnp.bfloat16):
    """One-time weight prep: fuse layer-1, pad hidden dim to 128 lanes, cast dtypes.

    Hoisted out of the forward pass so the concat/cast/pad HBM traffic is not paid on
    every call. The returned dict is what mlp_base_forward consumes directly.
    """
    H = params["wc2"].shape[1]
    Hp = _round_up(H, 128)  # lane-aligned hidden width (a2c defaults 64/512 -> 128/512)
    K = params["wc1"].shape[0]

    def pad(w, rows, cols):
        w = jnp.asarray(w, jnp.float32)
        if w.shape == (rows, cols):
            return w
        return jnp.zeros((rows, cols), jnp.float32).at[:w.shape[0], :w.shape[1]].set(w)

    wc1 = pad(params["wc1"], K, Hp)
    wa1 = pad(params["wa1"], K, Hp)
    w1 = jnp.concatenate([wc1, wa1], axis=1).astype(matmul_dtype)          # [K, 2Hp]
    b1 = jnp.concatenate([pad(params["bc1"], 1, Hp),
                          pad(params["ba1"], 1, Hp)], axis=1)              # [1, 2Hp] f32

    return {
        "w1": w1, "b1": b1,
        "wc2": pad(params["wc2"], Hp, Hp).astype(matmul_dtype),
        "bc2": pad(params["bc2"], 1, Hp),
        "wa2": pad(params["wa2"], Hp, Hp).astype(matmul_dtype),
        "ba2": pad(params["ba2"], 1, Hp),
        "wv": pad(params["wv"].reshape(1, H), 1, Hp),                      # row layout, f32
        "bv": jnp.asarray(params["bv"], jnp.float32).reshape(1, 1),
        "hidden_size": H,
    }


def _mlp_base_kernel(x_ref,
                     w1_ref, b1_ref,        # fused layer-1: [K, 2Hp], [1, 2Hp]
                     wc2_ref, bc2_ref,      # critic layer-2: [Hp, Hp], [1, Hp]
                     wa2_ref, ba2_ref,      # actor  layer-2: [Hp, Hp], [1, Hp]
                     wv_ref, bv_ref,        # value head:     [1, Hp], [1, 1]
                     value_ref, actor_ref,
                     *, matmul_dtype, epilogue_dtype):
    Hp = wc2_ref.shape[0]
    x = x_ref[...].astype(matmul_dtype)

    # ---- layer 1: critic + actor fused along N; f32 MXU accumulate, f32 bias add,
    #      tanh in epilogue_dtype (bf16 on v6e/v7x halves EUP time, f32 elsewhere) ----
    # (For strict f32 parity vs PyTorch at large K/H, run the f32 matmul path under
    #  jax.default_matmul_precision('highest'); the default bf16 path is the fast one.)
    h1 = jnp.tanh((jnp.dot(x, w1_ref[...], preferred_element_type=jnp.float32)
                   + b1_ref[...]).astype(epilogue_dtype))
    hc1 = h1[:, :Hp].astype(matmul_dtype)   # lane-aligned slice (Hp % 128 == 0)
    ha1 = h1[:, Hp:].astype(matmul_dtype)

    # ---- layer 2: independent weights -> two matmuls ----
    hc = jnp.tanh((jnp.dot(hc1, wc2_ref[...], preferred_element_type=jnp.float32)
                   + bc2_ref[...]).astype(epilogue_dtype))
    ha = jnp.tanh((jnp.dot(ha1, wa2_ref[...], preferred_element_type=jnp.float32)
                   + ba2_ref[...]).astype(epilogue_dtype))

    # ---- value head on the VPU/XLU, accumulated in f32 (avoid an N=1 MXU matmul) ----
    v = jnp.sum(hc.astype(jnp.float32) * wv_ref[...], axis=-1, keepdims=True) + bv_ref[...]

    value_ref[...] = v.astype(value_ref.dtype)        # (TB, 1) -> tiny HBM writeback
    actor_ref[...] = ha.astype(actor_ref.dtype)       # (TB, Hp) lane-dense store


def mlp_base_forward(inputs, rnn_hxs, masks, params, *,
                     matmul_dtype=jnp.bfloat16, epilogue_dtype=None,
                     block_b=512, actor_dtype=jnp.float32, value_dtype=jnp.float32):
    """Pallas-backed MLPBase.forward (recurrent=False).

    `params` may be raw MLPBase params or the output of prepare_mlp_base_params
    (preferred: prepare once, reuse across calls). Returns (value [B,1],
    hidden_actor [B,H], rnn_hxs); masks are unused on the non-recurrent path,
    matching PyTorch. Set actor_dtype/value_dtype to bf16 if the downstream policy
    head tolerates it (halves the dominant HBM writeback stream).
    """
    del masks  # recurrent=False: masks only feed the (unimplemented) GRU path
    if "w1" not in params:   # raw params -> prepare here (better: hoist to caller)
        params = prepare_mlp_base_params(params, matmul_dtype=matmul_dtype)

    B, num_inputs = inputs.shape
    H = params["hidden_size"]
    Hp = params["wc2"].shape[0]
    matmul_dtype = params["w1"].dtype
    if epilogue_dtype is None:
        epilogue_dtype = _default_epilogue_dtype(matmul_dtype)

    # Batch tiling: TB rows per grid step (multiple of 8 sublanes). Keep >= 2 grid
    # steps when the batch allows it so the "parallel" axis can shard across both
    # v7x TensorCores; ragged batches use Pallas boundary-block masking (no pad copy).
    TB = min(block_b, _round_up(B, 8))
    if B > 8 and pl.cdiv(B, TB) < 2:
        TB = max(8, _round_up(pl.cdiv(B, 2), 8))
    grid = (pl.cdiv(B, TB),)

    weight_args = (params["w1"], params["b1"], params["wc2"], params["bc2"],
                   params["wa2"], params["ba2"], params["wv"], params["bv"])
    # Weights: constant block index -> loaded once, VMEM-resident across grid steps.
    resident = lambda shape: pl.BlockSpec(shape, lambda i: (0,) * len(shape))

    in_specs = [pl.BlockSpec((TB, num_inputs), lambda i: (i, 0))]
    in_specs += [resident(w.shape) for w in weight_args]
    out_specs = [pl.BlockSpec((TB, 1), lambda i: (i, 0)),
                 pl.BlockSpec((TB, Hp), lambda i: (i, 0))]

    value, actor_padded = pl.pallas_call(
        functools.partial(_mlp_base_kernel,
                          matmul_dtype=matmul_dtype, epilogue_dtype=epilogue_dtype),
        out_shape=(jax.ShapeDtypeStruct((B, 1), value_dtype),
                   jax.ShapeDtypeStruct((B, Hp), actor_dtype)),
        grid=grid,
        in_specs=in_specs,
        out_specs=out_specs,
        compiler_params=pltpu.CompilerParams(
            # batch tiles are independent -> megacore sharding on v7x, harmless elsewhere
            dimension_semantics=("parallel",),
            # explicit scoped-VMEM budget so larger TB sweeps don't hit the default cap
            vmem_limit_bytes=64 * 1024 * 1024),
    )(inputs, *weight_args)

    hidden_actor = actor_padded if Hp == H else actor_padded[:, :H]

    # TODO(synk): GRU (_forward_gru) path for recurrent=True not implemented.
    return value, hidden_actor, rnn_hxs


def init_mlp_base_params(key, num_inputs, hidden_size):
    """Deterministic init matching MLPBase.__init__: orthogonal(gain=sqrt(2)) weights, zero biases."""
    orth = jax.nn.initializers.orthogonal(scale=float(np.sqrt(2.0)))
    ks = jax.random.split(key, 5)
    f32 = jnp.float32
    return {
        # critic: Linear(num_inputs, H), Tanh, Linear(H, H), Tanh
        "wc1": orth(ks[0], (num_inputs, hidden_size), f32),
        "bc1": jnp.zeros((1, hidden_size), f32),
        "wc2": orth(ks[1], (hidden_size, hidden_size), f32),
        "bc2": jnp.zeros((1, hidden_size), f32),
        # actor: Linear(num_inputs, H), Tanh, Linear(H, H), Tanh
        "wa1": orth(ks[2], (num_inputs, hidden_size), f32),
        "ba1": jnp.zeros((1, hidden_size), f32),
        "wa2": orth(ks[3], (hidden_size, hidden_size), f32),
        "ba2": jnp.zeros((1, hidden_size), f32),
        # critic_linear: Linear(H, 1)
        "wv": orth(ks[4], (hidden_size, 1), f32),
        "bv": jnp.zeros((1, 1), f32),
    }


def _reference_forward(inputs, rnn_hxs, params):
    hc = jnp.tanh(inputs @ params["wc1"] + params["bc1"])
    hc = jnp.tanh(hc @ params["wc2"] + params["bc2"])
    ha = jnp.tanh(inputs @ params["wa1"] + params["ba1"])
    ha = jnp.tanh(ha @ params["wa2"] + params["ba2"])
    value = hc @ params["wv"] + params["bv"]
    return value, ha, rnn_hxs


if __name__ == "__main__":
    key = jax.random.PRNGKey(0)
    k_param, k_x = jax.random.split(key, 2)

    batch = 8
    num_inputs = 16
    hidden_size = 32   # small stand-in for the module's hidden_size=512 (exercises H->128 padding)

    params = init_mlp_base_params(k_param, num_inputs, hidden_size)
    inputs = jax.random.normal(k_x, (batch, num_inputs), jnp.float32)
    rnn_hxs = jnp.zeros((batch, 1), jnp.float32)   # recurrent_hidden_state_size == 1
    masks = jnp.ones((batch, 1), jnp.float32)

    v_ref, a_ref, _ = _reference_forward(inputs, rnn_hxs, params)

    # f32 matmul path with weight prep hoisted out (done once, reused below).
    prep_f32 = prepare_mlp_base_params(params, matmul_dtype=jnp.float32)
    v32, a32, hxs_out = mlp_base_forward(inputs, rnn_hxs, masks, prep_f32)
    jax.block_until_ready((v32, a32, hxs_out))
    assert v32.shape == (batch, 1) and a32.shape == (batch, hidden_size)
    np.testing.assert_allclose(np.asarray(v32), np.asarray(v_ref), rtol=1e-5, atol=1e-5)
    np.testing.assert_allclose(np.asarray(a32), np.asarray(a_ref), rtol=1e-5, atol=1e-5)

    # bf16 fast path (default): raw params prepared internally; looser tolerance.
    vbf, abf, _ = mlp_base_forward(inputs, rnn_hxs, masks, params)
    jax.block_until_ready((vbf, abf))
    np.testing.assert_allclose(np.asarray(vbf), np.asarray(v_ref), rtol=1e-1, atol=1e-1)
    np.testing.assert_allclose(np.asarray(abf), np.asarray(a_ref), rtol=1e-1, atol=1e-1)

    # Ragged batch: multi-step grid with a partial boundary block (no explicit pad copy).
    batch2 = 12
    inputs2 = jax.random.normal(jax.random.PRNGKey(1), (batch2, num_inputs), jnp.float32)
    rnn_hxs2 = jnp.zeros((batch2, 1), jnp.float32)
    masks2 = jnp.ones((batch2, 1), jnp.float32)
    v2, a2, _ = mlp_base_forward(inputs2, rnn_hxs2, masks2, prep_f32, block_b=8)
    jax.block_until_ready((v2, a2))
    v2_ref, a2_ref, _ = _reference_forward(inputs2, rnn_hxs2, params)
    np.testing.assert_allclose(np.asarray(v2), np.asarray(v2_ref), rtol=1e-5, atol=1e-5)
    np.testing.assert_allclose(np.asarray(a2), np.asarray(a2_ref), rtol=1e-5, atol=1e-5)

    # Default block_b with a batch that triggers the >=2-step split (v7x megacore path).
    batch3 = 16
    inputs3 = jax.random.normal(jax.random.PRNGKey(2), (batch3, num_inputs), jnp.float32)
    rnn_hxs3 = jnp.zeros((batch3, 1), jnp.float32)
    masks3 = jnp.ones((batch3, 1), jnp.float32)
    v3, a3, _ = mlp_base_forward(inputs3, rnn_hxs3, masks3, prep_f32)
    jax.block_until_ready((v3, a3))
    v3_ref, a3_ref, _ = _reference_forward(inputs3, rnn_hxs3, params)
    np.testing.assert_allclose(np.asarray(v3), np.asarray(v3_ref), rtol=1e-5, atol=1e-5)
    np.testing.assert_allclose(np.asarray(a3), np.asarray(a3_ref), rtol=1e-5, atol=1e-5)

    print("KERNEL_OK")
</pallas_src>

<mosaic_0001>
module attributes {stable_mosaic.version = 11 : i64} {
  func.func @_mlp_base_kernel(%arg0: i32, %arg1: memref<8x16xf32, #tpu.memory_space<vmem>>, %arg2: memref<16x256xf32, #tpu.memory_space<vmem>>, %arg3: memref<1x256xf32, #tpu.memory_space<vmem>>, %arg4: memref<128x128xf32, #tpu.memory_space<vmem>>, %arg5: memref<1x128xf32, #tpu.memory_space<vmem>>, %arg6: memref<128x128xf32, #tpu.memory_space<vmem>>, %arg7: memref<1x128xf32, #tpu.memory_space<vmem>>, %arg8: memref<1x128xf32, #tpu.memory_space<vmem>>, %arg9: memref<1x1xf32, #tpu.memory_space<vmem>>, %arg10: memref<8x1xf32, #tpu.memory_space<vmem>>, %arg11: memref<8x128xf32, #tpu.memory_space<vmem>>) attributes {dimension_semantics = [#tpu.dimension_semantics<parallel>], iteration_bounds = array<i64: 1>, scalar_prefetch = 0 : i64, scratch_operands = 0 : i64, tpu.core_type = #tpu.core_type<tc>, window_params = [{transform_indices = @transform_0, window_bounds = array<i64: 8, 16>}, {pipeline_mode = #tpu.pipeline_mode<synchronous>, transform_indices = @transform_1, window_bounds = array<i64: 16, 256>}, {pipeline_mode = #tpu.pipeline_mode<synchronous>, transform_indices = @transform_2, window_bounds = array<i64: 1, 256>}, {pipeline_mode = #tpu.pipeline_mode<synchronous>, transform_indices = @transform_3, window_bounds = array<i64: 128, 128>}, {pipeline_mode = #tpu.pipeline_mode<synchronous>, transform_indices = @transform_4, window_bounds = array<i64: 1, 128>}, {pipeline_mode = #tpu.pipeline_mode<synchronous>, transform_indices = @transform_5, window_bounds = array<i64: 128, 128>}, {pipeline_mode = #tpu.pipeline_mode<synchronous>, transform_indices = @transform_6, window_bounds = array<i64: 1, 128>}, {pipeline_mode = #tpu.pipeline_mode<synchronous>, transform_indices = @transform_7, window_bounds = array<i64: 1, 128>}, {pipeline_mode = #tpu.pipeline_mode<synchronous>, transform_indices = @transform_8, window_bounds = array<i64: 1, 1>}, {transform_indices = @transform_9, window_bounds = array<i64: 8, 1>}, {transform_indices = @transform_10, window_bounds = array<i64: 8, 128>}]} {
    %c0 = arith.constant 0 : index
    %c0_0 = arith.constant 0 : index
    %0 = vector.load %arg1[%c0, %c0_0] : memref<8x16xf32, #tpu.memory_space<vmem>>, vector<8x16xf32>
    %c0_1 = arith.constant 0 : index
    %c0_2 = arith.constant 0 : index
    %1 = vector.load %arg2[%c0_1, %c0_2] : memref<16x256xf32, #tpu.memory_space<vmem>>, vector<16x256xf32>
    %cst = arith.constant dense<0.000000e+00> : vector<8x256xf32>
    %2 = tpu.matmul %0, %1, %cst {dimension_numbers = #tpu.dot_dimension_numbers<[1], [0], [0], [1], [0, 0, 1, 1], [], []>} : vector<8x16xf32>, vector<16x256xf32>, vector<8x256xf32> -> vector<8x256xf32>
    %c0_3 = arith.constant 0 : index
    %c0_4 = arith.constant 0 : index
    %3 = vector.load %arg3[%c0_3, %c0_4] : memref<1x256xf32, #tpu.memory_space<vmem>>, vector<1x256xf32>
    %4 = vector.broadcast %3 : vector<1x256xf32> to vector<8x256xf32>
    %5 = arith.addf %2, %4 : vector<8x256xf32>
    %6 = math.tanh %5 : vector<8x256xf32>
    %7 = vector.extract_strided_slice %6 {offsets = [0, 0], sizes = [8, 128], strides = [1, 1]} : vector<8x256xf32> to vector<8x128xf32>
    %8 = vector.extract_strided_slice %6 {offsets = [0, 128], sizes = [8, 128], strides = [1, 1]} : vector<8x256xf32> to vector<8x128xf32>
    %c0_5 = arith.constant 0 : index
    %c0_6 = arith.constant 0 : index
    %9 = vector.load %arg4[%c0_5, %c0_6] : memref<128x128xf32, #tpu.memory_space<vmem>>, vector<128x128xf32>
    %cst_7 = arith.constant dense<0.000000e+00> : vector<8x128xf32>
    %10 = tpu.matmul %7, %9, %cst_7 {dimension_numbers = #tpu.dot_dimension_numbers<[1], [0], [0], [1], [0, 0, 1, 1], [], []>} : vector<8x128xf32>, vector<128x128xf32>, vector<8x128xf32> -> vector<8x128xf32>
    %c0_8 = arith.constant 0 : index
    %c0_9 = arith.constant 0 : index
    %11 = vector.load %arg5[%c0_8, %c0_9] : memref<1x128xf32, #tpu.memory_space<vmem>>, vector<1x128xf32>
    %12 = vector.broadcast %11 : vector<1x128xf32> to vector<8x128xf32>
    %13 = arith.addf %10, %12 : vector<8x128xf32>
    %14 = math.tanh %13 : vector<8x128xf32>
    %c0_10 = arith.constant 0 : index
    %c0_11 = arith.constant 0 : index
    %15 = vector.load %arg6[%c0_10, %c0_11] : memref<128x128xf32, #tpu.memory_space<vmem>>, vector<128x128xf32>
    %cst_12 = arith.constant dense<0.000000e+00> : vector<8x128xf32>
    %16 = tpu.matmul %8, %15, %cst_12 {dimension_numbers = #tpu.dot_dimension_numbers<[1], [0], [0], [1], [0, 0, 1, 1], [], []>} : vector<8x128xf32>, vector<128x128xf32>, vector<8x128xf32> -> vector<8x128xf32>
    %c0_13 = arith.constant 0 : index
    %c0_14 = arith.constant 0 : index
    %17 = vector.load %arg7[%c0_13, %c0_14] : memref<1x128xf32, #tpu.memory_space<vmem>>, vector<1x128xf32>
    %18 = vector.broadcast %17 : vector<1x128xf32> to vector<8x128xf32>
    %19 = arith.addf %16, %18 : vector<8x128xf32>
    %20 = math.tanh %19 : vector<8x128xf32>
    %c0_15 = arith.constant 0 : index
    %c0_16 = arith.constant 0 : index
    %21 = vector.load %arg8[%c0_15, %c0_16] : memref<1x128xf32, #tpu.memory_space<vmem>>, vector<1x128xf32>
    %22 = vector.broadcast %21 : vector<1x128xf32> to vector<8x128xf32>
    %23 = arith.mulf %14, %22 : vector<8x128xf32>
    %cst_17 = arith.constant dense<0.000000e+00> : vector<8xf32>
    %24 = vector.multi_reduction <add>, %23, %cst_17 [1] : vector<8x128xf32> to vector<8xf32>
    %25 = vector.shape_cast %24 : vector<8xf32> to vector<8x1xf32>
    %c0_18 = arith.constant 0 : index
    %c0_19 = arith.constant 0 : index
    %26 = vector.load %arg9[%c0_18, %c0_19] : memref<1x1xf32, #tpu.memory_space<vmem>>, vector<1x1xf32>
    %27 = vector.broadcast %26 : vector<1x1xf32> to vector<8x1xf32>
    %28 = arith.addf %25, %27 : vector<8x1xf32>
    %c0_20 = arith.constant 0 : index
    %c0_21 = arith.constant 0 : index
    %29 = vector.load %arg10[%c0_20, %c0_21] : memref<8x1xf32, #tpu.memory_space<vmem>>, vector<8x1xf32>
    tpu.vector_store %arg10[%c0_20, %c0_21], %28 {strides = array<i32>} : memref<8x1xf32, #tpu.memory_space<vmem>>, vector<8x1xf32>,
    %c0_22 = arith.constant 0 : index
    %c0_23 = arith.constant 0 : index
    %30 = vector.load %arg11[%c0_22, %c0_23] : memref<8x128xf32, #tpu.memory_space<vmem>>, vector<8x128xf32>
    tpu.vector_store %arg11[%c0_22, %c0_23], %20 {strides = array<i32>} : memref<8x128xf32, #tpu.memory_space<vmem>>, vector<8x128xf32>,
    return
  }
  func.func @transform_0(%arg0: i32) -> (i32, i32) {
    %c0_i32 = arith.constant 0 : i32
    %c0_i32_0 = arith.constant 0 : i32
    return %arg0, %c0_i32 : i32, i32
  }
  func.func @transform_1(%arg0: i32) -> (i32, i32) {
    %c0_i32 = arith.constant 0 : i32
    %c0_i32_0 = arith.constant 0 : i32
    %c0_i32_1 = arith.constant 0 : i32
    return %c0_i32, %c0_i32_0 : i32, i32
  }
  func.func @transform_2(%arg0: i32) -> (i32, i32) {
    %c0_i32 = arith.constant 0 : i32
    %c0_i32_0 = arith.constant 0 : i32
    %c0_i32_1 = arith.constant 0 : i32
    return %c0_i32, %c0_i32_0 : i32, i32
  }
  func.func @transform_3(%arg0: i32) -> (i32, i32) {
    %c0_i32 = arith.constant 0 : i32
    %c0_i32_0 = arith.constant 0 : i32
    %c0_i32_1 = arith.constant 0 : i32
    return %c0_i32, %c0_i32_0 : i32, i32
  }
  func.func @transform_4(%arg0: i32) -> (i32, i32) {
    %c0_i32 = arith.constant 0 : i32
    %c0_i32_0 = arith.constant 0 : i32
    %c0_i32_1 = arith.constant 0 : i32
    return %c0_i32, %c0_i32_0 : i32, i32
  }
  func.func @transform_5(%arg0: i32) -> (i32, i32) {
    %c0_i32 = arith.constant 0 : i32
    %c0_i32_0 = arith.constant 0 : i32
    %c0_i32_1 = arith.constant 0 : i32
    return %c0_i32, %c0_i32_0 : i32, i32
  }
  func.func @transform_6(%arg0: i32) -> (i32, i32) {
    %c0_i32 = arith.constant 0 : i32
    %c0_i32_0 = arith.constant 0 : i32
    %c0_i32_1 = arith.constant 0 : i32
    return %c0_i32, %c0_i32_0 : i32, i32
  }
  func.func @transform_7(%arg0: i32) -> (i32, i32) {
    %c0_i32 = arith.constant 0 : i32
    %c0_i32_0 = arith.constant 0 : i32
    %c0_i32_1 = arith.constant 0 : i32
    return %c0_i32, %c0_i32_0 : i32, i32
  }
  func.func @transform_8(%arg0: i32) -> (i32, i32) {
    %c0_i32 = arith.constant 0 : i32
    %c0_i32_0 = arith.constant 0 : i32
    %c0_i32_1 = arith.constant 0 : i32
    return %c0_i32, %c0_i32_0 : i32, i32
  }
  func.func @transform_9(%arg0: i32) -> (i32, i32) {
    %c0_i32 = arith.constant 0 : i32
    %c0_i32_0 = arith.constant 0 : i32
    return %arg0, %c0_i32 : i32, i32
  }
  func.func @transform_10(%arg0: i32) -> (i32, i32) {
    %c0_i32 = arith.constant 0 : i32
    %c0_i32_0 = arith.constant 0 : i32
    return %arg0, %c0_i32 : i32, i32
  }
}

</mosaic_0001>

<bundles_post_ra>
// kernel: tpu_custom_call.1
= control target key start
LH: loop header
LB: loop body
LE: loop exit
PB: predicated region body
PF: predicated region fallthrough
CT: control target
= control target key end

     0   :  { %s1107_s0 = inlined_call_operand.hbm [shape: f32[8,16], index: 0, kind: input, shape index: {}]   ;;  %s1108_s1 = inlined_call_operand.hbm [shape: f32[16,256], index: 1, kind: input, shape index: {}]   ;;  %s1109_s2 = inlined_call_operand.hbm [shape: f32[1,256], index: 2, kind: input, shape index: {}]   ;;  %s1110_s3 = inlined_call_operand.hbm [shape: f32[128,128], index: 3, kind: input, shape index: {}]   ;;  %s1111_s4 = inlined_call_operand.hbm [shape: f32[1,128], index: 4, kind: input, shape index: {}]   ;;  %s1112_s5 = inlined_call_operand.hbm [shape: f32[128,128], index: 5, kind: input, shape index: {}]   ;;  %s1113_s6 = inlined_call_operand.hbm [shape: f32[1,128], index: 6, kind: input, shape index: {}]   ;;  %s1114_s7 = inlined_call_operand.hbm [shape: f32[1,128], index: 7, kind: input, shape index: {}]   ;;  %s1115_s8 = inlined_call_operand.<no memory space> [shape: f32[1,1], index: 8, kind: input, shape index: {}]   ;;  %s1116_s9 = inlined_call_operand.hbm [shape: f32[8,1], index: 9, kind: output, shape index: {0}]   ;;  %s1117_s10 = inlined_call_operand.hbm [shape: f32[8,128], index: 10, kind: output, shape index: {1}]  }
   0x1   :  { %v16_v0 = vstv %s1115_s8 }
   0x2   :  { %17 = vst [vmem:[#allocation2] sm:$0x1] %v16_v0 }
   0x3   :  { %18 = vsyncpa [#allocation4], 0 }
   0x4   :  { %19 = vsyncpa [#allocation7], 0 }
   0x5   :  { %20 = vsyncpa [#allocation10], 0 }
   0x6   :  { %21 = vsyncpa [#allocation13], 0 }
   0x7   :  { %22 = vsyncpa [#allocation16], 0 }
   0x8   :  { %23 = vsyncpa [#allocation5], 0 }
   0x9   :  { %24 = vsyncpa [#allocation19], 0  ;;  %s893_s15 = smov [#allocation6]   ;;  %s659_s19 = scalar_lea.hbm %s1108_s1, 512 }
   0xa   :  { %s40_s16 = sshll.u32 %s893_s15, 4  ;;  %p660_p0 = scmp.ne.s32.totalorder %s1108_s1, %s659_s19  ;;  %s41_s16 = int_to_ptr.vmem [resolvable:$true] %s40_s16 }
   0xb   :  { %p663_p1 = scmp.lt.u32.totalorder %s659_s19, %s1108_s1 }
   0xd   :  { %p665_p2 = pnand %p663_p1, %p660_p0 }
   0xf   :  { %668 = shalt.err (!%p665_p2)
}
  0x10   :  { %s669_s23 = scalar_lea.vmem %s41_s16, 512  ;;  %p674_p4 = scmp.lt.s32.totalorder %s41_s16, %s41_s16 }
  0x11   :  { %p670_p3 = scmp.ne.s32.totalorder %s41_s16, %s669_s23  ;;  %p675_p5 = scmp.lt.s32.totalorder %s669_s23, %s669_s23 }
  0x13   :  { %p676_p6 = por %p675_p5, %p674_p4 }
  0x15   :  { %p677_p7 = pnand %p676_p6, %p670_p3 }
  0x17   :  { %680 = shalt.err (!%p677_p7)
}
  0x18   :  { %s894_s24 = smov 256   ;;  %s895_s25 = smov 16  }
  0x19   :  { %46 = dma.hbm_to_vmem [thread:$0]  %s1108_s1, 512, %s41_s16, [#allocation7], %s894_s24, %s894_s24, %s895_s25  }
  0x1a   :  { %s896_s28 = smov [#allocation9]   ;;  %s681_s12 = scalar_lea.hbm %s1110_s3, 2048 }
  0x1b   :  { %s62_s29 = sshll.u32 %s896_s28, 4  ;;  %p682_p8 = scmp.ne.s32.totalorder %s1110_s3, %s681_s12  ;;  %s63_s29 = int_to_ptr.vmem [resolvable:$true] %s62_s29 }
  0x1c   :  { %p685_p9 = scmp.lt.u32.totalorder %s681_s12, %s1110_s3 }
  0x1e   :  { %p687_p10 = pnand %p685_p9, %p682_p8 }
  0x20   :  { %690 = shalt.err (!%p687_p10)
}
  0x21   :  { %s691_s18 = scalar_lea.vmem %s63_s29, 2048  ;;  %p696_p12 = scmp.lt.s32.totalorder %s63_s29, %s63_s29 }
  0x22   :  { %p692_p11 = scmp.ne.s32.totalorder %s63_s29, %s691_s18  ;;  %p697_p13 = scmp.lt.s32.totalorder %s691_s18, %s691_s18 }
  0x24   :  { %p698_p0 = por %p697_p13, %p696_p12 }
  0x26   :  { %p699_p1 = pnand %p698_p0, %p692_p11 }
  0x28   :  { %702 = shalt.err (!%p699_p1)
}
  0x29   :  { %s897_s1 = smov 128   ;;  %s898_s16 = smov 8  }
  0x2a   :  { %68 = dma.hbm_to_vmem [thread:$0]  %s1110_s3, 2048, %s63_s29, [#allocation10], %s897_s1, %s897_s1, %s898_s16  }
  0x2b   :  { %s899_s21 = smov [#allocation12]   ;;  %s900_s22 = smov [#allocation3]  }
  0x2c   :  { %s84_s8 = sshll.u32 %s899_s21, 4  ;;  %s31_s23 = sshll.u32 %s900_s22, 4  ;;  %s85_s8 = int_to_ptr.vmem [resolvable:$true] %s84_s8  ;;  %s32_s23 = int_to_ptr.vmem [resolvable:$true] %s31_s23 }
  0x2d   :  { %s703_s26 = scalar_lea.hbm %s1112_s5, 2048 }
  0x2e   :  { %p704_p2 = scmp.ne.s32.totalorder %s1112_s5, %s703_s26  ;;  %p707_p3 = scmp.lt.u32.totalorder %s703_s26, %s1112_s5 }
  0x30   :  { %p709_p4 = pnand %p707_p3, %p704_p2 }
  0x32   :  { %712 = shalt.err (!%p709_p4)
}
  0x33   :  { %s713_s3 = scalar_lea.vmem %s85_s8, 2048  ;;  %p718_p6 = scmp.lt.s32.totalorder %s85_s8, %s85_s8 }
  0x34   :  { %p714_p5 = scmp.ne.s32.totalorder %s85_s8, %s713_s3  ;;  %p719_p7 = scmp.lt.s32.totalorder %s713_s3, %s713_s3 }
  0x36   :  { %p720_p8 = por %p719_p7, %p718_p6 }
  0x38   :  { %p721_p9 = pnand %p720_p8, %p714_p5 }
  0x3a   :  { %724 = shalt.err (!%p721_p9)
}
  0x3b   :  { %90 = dma.hbm_to_vmem [thread:$0]  %s1112_s5, 2048, %s85_s8, [#allocation13], %s897_s1, %s897_s1, %s898_s16  }
  0x3c   :  { %s725_s15 = scalar_lea.hbm %s1107_s0, 128 }
  0x3d   :  { %p726_p10 = scmp.ne.s32.totalorder %s1107_s0, %s725_s15  ;;  %p729_p11 = scmp.lt.u32.totalorder %s725_s15, %s1107_s0 }
  0x3f   :  { %p731_p12 = pnand %p729_p11, %p726_p10 }
  0x41   :  { %734 = shalt.err (!%p731_p12)
}
  0x42   :  { %s735_s21 = scalar_lea.vmem %s32_s23, 128  ;;  %p740_p0 = scmp.lt.s32.totalorder %s32_s23, %s32_s23 }
  0x43   :  { %p736_p13 = scmp.ne.s32.totalorder %s32_s23, %s735_s21  ;;  %p741_p1 = scmp.lt.s32.totalorder %s735_s21, %s735_s21 }
  0x45   :  { %p742_p2 = por %p741_p1, %p740_p0 }
  0x47   :  { %p743_p3 = pnand %p742_p2, %p736_p13 }
  0x49   :  { %746 = shalt.err (!%p743_p3)
}
  0x4a   :  { %34 = dma.hbm_to_vmem [thread:$0]  %s1107_s0, 128, %s32_s23, [#allocation4]  }
  0x4b   :  { %s901_s16 = smov [#allocation8]   ;;  %s902_s22 = smov [#allocation11]  }
  0x4c   :  { %s53_s8 = sshll.u32 %s901_s16, 4  ;;  %s75_s24 = sshll.u32 %s902_s22, 4  ;;  %s54_s8 = int_to_ptr.vmem [resolvable:$true] %s53_s8  ;;  %s76_s24 = int_to_ptr.vmem [resolvable:$true] %s75_s24 }
  0x4d   :  { %s747_s27 = scalar_lea.hbm %s1109_s2, 32 }
  0x4e   :  { %p748_p4 = scmp.ne.s32.totalorder %s1109_s2, %s747_s27  ;;  %p751_p5 = scmp.lt.u32.totalorder %s747_s27, %s1109_s2 }
  0x50   :  { %p753_p6 = pnand %p751_p5, %p748_p4 }
  0x52   :  { %756 = shalt.err (!%p753_p6)
}
  0x53   :  { %s757_s0 = scalar_lea.vmem %s54_s8, 32  ;;  %p762_p8 = scmp.lt.s32.totalorder %s54_s8, %s54_s8 }
  0x54   :  { %p758_p7 = scmp.ne.s32.totalorder %s54_s8, %s757_s0  ;;  %p763_p9 = scmp.lt.s32.totalorder %s757_s0, %s757_s0 }
  0x56   :  { %p764_p10 = por %p763_p9, %p762_p8 }
  0x58   :  { %p765_p11 = pnand %p764_p10, %p758_p7 }
  0x5a   :  { %768 = shalt.err (!%p765_p11)
}
  0x5b   :  { %56 = dma.hbm_to_vmem [thread:$0]  %s1109_s2, 32, %s54_s8, [#allocation7]  }
  0x5c   :  { %s769_s14 = scalar_lea.hbm %s1111_s4, 16 }
  0x5d   :  { %p770_p12 = scmp.ne.s32.totalorder %s1111_s4, %s769_s14  ;;  %p773_p13 = scmp.lt.u32.totalorder %s769_s14, %s1111_s4 }
  0x5f   :  { %p775_p0 = pnand %p773_p13, %p770_p12 }
  0x61   :  { %778 = shalt.err (!%p775_p0)
}
  0x62   :  { %s779_s20 = scalar_lea.vmem %s76_s24, 16  ;;  %s783_s21 = scalar_lea.vmem %s76_s24, 32 }
  0x63   :  { %p780_p1 = scmp.ne.s32.totalorder %s76_s24, %s779_s20  ;;  %p784_p2 = scmp.lt.s32.totalorder %s76_s24, %s76_s24 }
  0x64   :  { %p785_p3 = scmp.lt.s32.totalorder %s783_s21, %s779_s20 }
  0x66   :  { %p786_p4 = por %p785_p3, %p784_p2 }
  0x68   :  { %p787_p5 = pnand %p786_p4, %p780_p1 }
  0x6a   :  { %790 = shalt.err (!%p787_p5)
}
  0x6b   :  { %78 = dma.hbm_to_vmem [thread:$0]  %s1111_s4, 16, %s76_s24, [#allocation10]  }
  0x6c   :  { %s903_s1 = smov [#allocation14]   ;;  %s904_s8 = smov [#allocation15]  }
  0x6d   :  { %s97_s16 = sshll.u32 %s903_s1, 4  ;;  %s107_s22 = sshll.u32 %s904_s8, 4  ;;  %s98_s16 = int_to_ptr.vmem [resolvable:$true] %s97_s16  ;;  %s108_s22 = int_to_ptr.vmem [resolvable:$true] %s107_s22 }
  0x6e   :  { %s791_s27 = scalar_lea.hbm %s1113_s6, 16 }
  0x6f   :  { %p792_p6 = scmp.ne.s32.totalorder %s1113_s6, %s791_s27  ;;  %p795_p7 = scmp.lt.u32.totalorder %s791_s27, %s1113_s6 }
  0x71   :  { %p797_p8 = pnand %p795_p7, %p792_p6 }
  0x73   :  { %800 = shalt.err (!%p797_p8)
}
  0x74   :  { %s801_s4 = scalar_lea.vmem %s98_s16, 16  ;;  %s805_s24 = scalar_lea.vmem %s98_s16, 32 }
  0x75   :  { %p802_p9 = scmp.ne.s32.totalorder %s98_s16, %s801_s4  ;;  %p806_p10 = scmp.lt.s32.totalorder %s98_s16, %s98_s16 }
  0x76   :  { %p807_p11 = scmp.lt.s32.totalorder %s805_s24, %s801_s4 }
  0x78   :  { %p808_p12 = por %p807_p11, %p806_p10 }
  0x7a   :  { %p809_p13 = pnand %p808_p12, %p802_p9 }
  0x7c   :  { %812 = shalt.err (!%p809_p13)
}
  0x7d   :  { %100 = dma.hbm_to_vmem [thread:$0]  %s1113_s6, 16, %s98_s16, [#allocation13]  }
  0x7e   :  { %s813_s13 = scalar_lea.hbm %s1114_s7, 16 }
  0x7f   :  { %p814_p0 = scmp.ne.s32.totalorder %s1114_s7, %s813_s13  ;;  %p817_p1 = scmp.lt.u32.totalorder %s813_s13, %s1114_s7 }
  0x81   :  { %p819_p2 = pnand %p817_p1, %p814_p0 }
  0x83   :  { %822 = shalt.err (!%p819_p2)
}
  0x84   :  { %s823_s19 = scalar_lea.vmem %s108_s22, 16  ;;  %s827_s20 = scalar_lea.vmem %s108_s22, 32 }
  0x85   :  { %p824_p3 = scmp.ne.s32.totalorder %s108_s22, %s823_s19  ;;  %p828_p4 = scmp.lt.s32.totalorder %s108_s22, %s108_s22 }
  0x86   :  { %p829_p5 = scmp.lt.s32.totalorder %s827_s20, %s823_s19 }
  0x88   :  { %p830_p6 = por %p829_p5, %p828_p4 }
  0x8a   :  { %p831_p7 = pnand %p830_p6, %p824_p3 }
  0x8c   :  { %834 = shalt.err (!%p831_p7)
}
  0x8d   :  { %110 = dma.hbm_to_vmem [thread:$0]  %s1114_s7, 16, %s108_s22, [#allocation16]  }
  0x8e   :  { %879 = dma.done.wait [#allocation4], 128  }
  0x8f   :  { %880 = vsyncadd [#allocation4], 4294967168 }
  0x90   :  { %881 = dma.done.wait [#allocation7], 544  }
  0x91   :  { %882 = vsyncadd [#allocation7], 4294966752 }
  0x92   :  { %883 = dma.done.wait [#allocation10], 2064  }
  0x93   :  { %884 = vsyncadd [#allocation10], 4294965232 }
  0x94   :  { %885 = dma.done.wait [#allocation13], 2064  }
  0x95   :  { %886 = vsyncadd [#allocation13], 4294965232 }
  0x96   :  { %887 = dma.done.wait [#allocation16], 16  }
  0x97   :  { %888 = vsyncadd [#allocation16], 4294967280  ;;  %v905_v1 = vmov 0.0   ;;  %v906_v2 = vmov 0.0|0.0   ;;  %v139_v3 = vld [vmem:[#allocation6 + $0x8] sm:$0xff]  ;;  %v141_v4 = vld [vmem:[#allocation6 + $0x18] sm:$0xff]  ;;  %v144_v58 = vlaneseq }
  0x98   :  { %222 = vmatprep.mubr.f32.mxu0 %v905_v1  ;;  %586 = vmatprep.subr.bf16.mxu1 %v906_v2  ;;  %v138_v5 = vld [vmem:[#allocation6] sm:$0xff]  ;;  %v582_v6 = vpack.c.bf16 %v141_v4, %v139_v3  ;;  %v140_v7 = vld [vmem:[#allocation6 + $0x10] sm:$0xff]  ;;  %v137_v16 = vld [vmem:[#allocation3] sm:$0xff]  ;;  %vm154_vm0 = vcmask 130048   ;;  %vm907_vm1 = vmmov 0   ;;  %s908_s7 = smov [#allocation18]  }
  0x99   :  { %v231_v8 = vld [vmem:[#allocation9] sm:$0xff]  ;;  %v584_v9 = vpack.c.bf16 %v140_v7, %v138_v5  ;;  %v232_v10 = vld [vmem:[#allocation9 + $0x8] sm:$0xff]  ;;  %v233_v14 = vld [vmem:[#allocation9 + $0x10] sm:$0xff]  ;;  %544 = vmatprep.mubr.msk.f32.mxu1 %vm907_vm1, %v905_v1  ;;  %v145_v59 = vshrl.u32 %v144_v58, 7  ;;  %s456_s2 = sshll.u32 %s908_s7, 4  ;;  %s457_s2 = int_to_ptr.vmem [resolvable:$true] %s456_s2 }
  0x9a   :  { %v325_v11 = vld [vmem:[#allocation12] sm:$0xff]  ;;  %v326_v12 = vld [vmem:[#allocation12 + $0x8] sm:$0xff]  ;;  %583 = vmatprep.subr.bf16.mxu0 %v582_v6  ;;  %v587_v13 = vpack.c.bf16 %v232_v10, %v231_v8  ;;  %v234_v15 = vld [vmem:[#allocation9 + $0x18] sm:$0xff]  ;;  %s835_s5 = scalar_lea.vmem %s457_s2, 128  ;;  %p840_p9 = scmp.lt.s32.totalorder %s457_s2, %s457_s2 }
  0x9b   :  { %585 = vmatpush1.bf16.msra.mxu0 %v584_v9  ;;  %v611_v17 = vpack.c.bf16 %v326_v12, %v325_v11  ;;  %v590_v18 = vpack.c.bf16 %v234_v15, %v233_v14  ;;  %v327_v19 = vld [vmem:[#allocation12 + $0x10] sm:$0xff]  ;;  %v328_v20 = vld [vmem:[#allocation12 + $0x18] sm:$0xff]  ;;  %v236_v22 = vld [vmem:[#allocation9 + $0x28] sm:$0xff]  ;;  %v146_v60 = vsub.s32 0, %v145_v59  ;;  %v150_v62 = vsub.s32 1, %v145_v59  ;;  %p836_p8 = scmp.ne.s32.totalorder %s457_s2, %s835_s5  ;;  %p841_p10 = scmp.lt.s32.totalorder %s835_s5, %s835_s5 }
  0x9c   :  { %588 = vmatpush3.bf16.msra.mxu1 %v587_v13  ;;  %610 = vmatprep.subr.bf16.mxu0 %v906_v2  ;;  %v235_v21 = vld [vmem:[#allocation9 + $0x20] sm:$0xff]  ;;  %v614_v23 = vpack.c.bf16 %v328_v20, %v327_v19  ;;  %v330_v26 = vld [vmem:[#allocation12 + $0x28] sm:$0xff]  ;;  %v238_v28 = vld [vmem:[#allocation9 + $0x38] sm:$0xff] }
  0x9d   :  { %589 = vmatprep.subr.bf16.mxu1 %v906_v2  ;;  %v593_v24 = vpack.c.bf16 %v236_v22, %v235_v21  ;;  %v329_v25 = vld [vmem:[#allocation12 + $0x20] sm:$0xff]  ;;  %v237_v27 = vld [vmem:[#allocation9 + $0x30] sm:$0xff]  ;;  %v332_v32 = vld [vmem:[#allocation12 + $0x38] sm:$0xff]  ;;  %p842_p11 = por %p841_p10, %p840_p9 }
  0x9e   :  { %473 = vmatmul.mubr.msk.f32.vlgmr.msra.gmra.mrb[0].mxu0 %vm154_vm0, %v137_v16  ;;  %v617_v29 = vpack.c.bf16 %v330_v26, %v329_v25  ;;  %v596_v30 = vpack.c.bf16 %v238_v28, %v237_v27  ;;  %v331_v31 = vld [vmem:[#allocation12 + $0x30] sm:$0xff]  ;;  %v239_v33 = vld [vmem:[#allocation9 + $0x40] sm:$0xff]  ;;  %v240_v34 = vld [vmem:[#allocation9 + $0x48] sm:$0xff] }
  0x9f   :  { %612 = vmatpush3.bf16.msra.mxu0 %v611_v17  ;;  %v620_v35 = vpack.c.bf16 %v332_v32, %v331_v31  ;;  %v599_v36 = vpack.c.bf16 %v240_v34, %v239_v33  ;;  %v333_v37 = vld [vmem:[#allocation12 + $0x40] sm:$0xff]  ;;  %v334_v38 = vld [vmem:[#allocation12 + $0x48] sm:$0xff]  ;;  %v242_v41 = vld [vmem:[#allocation9 + $0x58] sm:$0xff]  ;;  %579 = vmatprep.mubr.msk.f32.mxu0 %vm907_vm1, %v905_v1  ;;  %p843_p12 = pnand %p842_p11, %p836_p8 }
  0xa0   :  { %591 = vmatpush3.bf16.msra.mxu1 %v590_v18  ;;  %613 = vmatprep.subr.bf16.mxu0 %v906_v2  ;;  %v623_v39 = vpack.c.bf16 %v334_v38, %v333_v37  ;;  %v241_v40 = vld [vmem:[#allocation9 + $0x50] sm:$0xff]  ;;  %v336_v44 = vld [vmem:[#allocation12 + $0x58] sm:$0xff]  ;;  %v244_v47 = vld [vmem:[#allocation9 + $0x68] sm:$0xff] }
  0xa1   :  { %592 = vmatprep.subr.bf16.mxu1 %v906_v2  ;;  %v602_v42 = vpack.c.bf16 %v242_v41, %v241_v40  ;;  %v335_v43 = vld [vmem:[#allocation12 + $0x50] sm:$0xff]  ;;  %v243_v46 = vld [vmem:[#allocation9 + $0x60] sm:$0xff]  ;;  %v338_v50 = vld [vmem:[#allocation12 + $0x68] sm:$0xff] }
  0xa2   :  { %v626_v45 = vpack.c.bf16 %v336_v44, %v335_v43  ;;  %v337_v48 = vld [vmem:[#allocation12 + $0x60] sm:$0xff]  ;;  %v605_v49 = vpack.c.bf16 %v244_v47, %v243_v46  ;;  %v245_v51 = vld [vmem:[#allocation9 + $0x70] sm:$0xff]  ;;  %v246_v52 = vld [vmem:[#allocation9 + $0x78] sm:$0xff] }
  0xa3   :  { %615 = vmatpush3.bf16.msra.mxu0 %v614_v23  ;;  %v629_v53 = vpack.c.bf16 %v338_v50, %v337_v48  ;;  %v339_v54 = vld [vmem:[#allocation12 + $0x70] sm:$0xff]  ;;  %v340_v55 = vld [vmem:[#allocation12 + $0x78] sm:$0xff]  ;;  %v608_v56 = vpack.c.bf16 %v246_v52, %v245_v51  ;;  %v475_v8 = vld [vmem:[#allocation14] ss:$0 sm:$0xff] }
  0xa4   :  { %594 = vmatpush3.bf16.msra.mxu1 %v593_v24  ;;  %616 = vmatprep.subr.bf16.mxu0 %v906_v2  ;;  %v632_v57 = vpack.c.bf16 %v340_v55, %v339_v54  ;;  %v142_v61 = vld [vmem:[#allocation8] sm:$0x3]  ;;  %v476_v15 = vld [vmem:[#allocation15] ss:$0 sm:$0xff] }
  0xa5   :  { %595 = vmatprep.subr.bf16.mxu1 %v906_v2  ;;  %v147_v63 = vrot.slane %v142_v61, %v146_v60  ;;  %v151_v0 = vrot.slane %v142_v61, %v150_v62 }
  0xa7   :  { %618 = vmatpush3.bf16.msra.mxu0 %v617_v29 }
  0xa8   :  { %597 = vmatpush3.bf16.msra.mxu1 %v596_v30  ;;  %619 = vmatprep.subr.bf16.mxu0 %v906_v2 }
  0xa9   :  { %598 = vmatprep.subr.bf16.mxu1 %v906_v2 }
  0xab   :  { %621 = vmatpush3.bf16.msra.mxu0 %v620_v35 }
  0xac   :  { %600 = vmatpush3.bf16.msra.mxu1 %v599_v36  ;;  %622 = vmatprep.subr.bf16.mxu0 %v906_v2 }
  0xad   :  { %601 = vmatprep.subr.bf16.mxu1 %v906_v2 }
  0xaf   :  { %624 = vmatpush3.bf16.msra.mxu0 %v623_v39 }
  0xb0   :  { %625 = vmatprep.subr.bf16.mxu0 %v906_v2  ;;  %603 = vmatpush3.bf16.msra.mxu1 %v602_v42 }
  0xb1   :  { %604 = vmatprep.subr.bf16.mxu1 %v906_v2 }
  0xb3   :  { %627 = vmatpush3.bf16.msra.mxu0 %v626_v45 }
  0xb4   :  { %628 = vmatprep.subr.bf16.mxu0 %v906_v2  ;;  %606 = vmatpush3.bf16.msra.mxu1 %v605_v49 }
  0xb5   :  { %607 = vmatprep.subr.bf16.mxu1 %v906_v2 }
  0xb7   :  { %630 = vmatpush3.bf16.msra.mxu0 %v629_v53 }
  0xb8   :  { %631 = vmatprep.subr.bf16.mxu0 %v906_v2  ;;  %609 = vmatpush3.bf16.msra.mxu1 %v608_v56  ;;  %v474_v2 = vld [vmem:[#allocation11] ss:$0 sm:$0xff] }
  0xbb   :  { %633 = vmatpush3.bf16.msra.mxu0 %v632_v57 }
 0x171   :  { %v224_v3 = vpop.f32.mrb[0].mxu0 }
 0x172   :  { %v225_v4 = vadd.f32 %v224_v3, %v147_v63  ;;  %v226_v1 = vpop.f32.mrb[1].mxu0 }
 0x173   :  { %v227_v5 = vadd.f32 %v226_v1, %v151_v0 }
 0x174   :  { %651 = vtanh.f32 %v225_v4 }
 0x175   :  { %653 = vtanh.f32 %v227_v5 }
 0x17e   :  { %v652_v6 = vpop.eup %651 }
 0x17f   :  { %v654_v7 = vpop.eup %653  ;;  %545 = vmatmul.mubr.f32.vlgmr.msra.gmra.mrb[0].mxu1 %v652_v6 }
 0x180   :  { %580 = vmatmul.mubr.f32.vlgmr.msra.gmra.mrb[2].mxu0 %v654_v7 }
 0x252   :  { %v320_v9 = vpop.f32.mrb[0].mxu1 }
 0x253   :  { %v321_v10 = vadd.f32 %v474_v2, %v320_v9  ;;  %v546_v11 = vpop.f32.mrb[1].mxu1  ;;  %v414_v12 = vpop.f32.mrb[2].mxu0 }
 0x254   :  { %v415_v13 = vadd.f32 %v475_v8, %v414_v12  ;;  %v581_v14 = vpop.f32.mrb[3].mxu0 }
 0x255   :  { %655 = vtanh.f32 %v321_v10 }
 0x256   :  { %657 = vtanh.f32 %v415_v13 }
 0x25f   :  { %v656_v16 = vpop.eup %655 }
 0x260   :  { %v658_v17 = vpop.eup %657  ;;  %v426_v18 = vmul.f32 %v656_v16, %v476_v15 }
 0x261   :  { %439 = vst [vmem:[#allocation18] sm:$0xff] %v658_v17 }
 0x262   :  { %427 = vadd.xlane.f32.xlu0 %v426_v18 }
 0x263   :  { %846 = shalt.err (!%p843_p12)
}
 0x264   :  { %s847_s8 = scalar_lea.hbm %s1117_s10, 128 }
 0x265   :  { %p848_p13 = scmp.ne.s32.totalorder %s1117_s10, %s847_s8  ;;  %p851_p0 = scmp.lt.u32.totalorder %s847_s8, %s1117_s10 }
 0x267   :  { %p853_p1 = pnand %p851_p0, %p848_p13 }
 0x269   :  { %856 = shalt.err (!%p853_p1)
}
 0x26a   :  { %459 = dma.vmem_to_hbm [thread:$0]  %s457_s2, 128, %s1117_s10, [#allocation19]   ;;  %v477_v19 = vld [vmem:[#allocation2] ss:$0 sm:$0xff]  ;;  %vm437_vm2 = vcmask 7168  }
 0x26b   :  { %s909_s11 = smov [#allocation17]  }
 0x26c   :  { %s446_s3 = sshll.u32 %s909_s11, 4  ;;  %s447_s3 = int_to_ptr.vmem [resolvable:$true] %s446_s3 }
 0x26d   :  { %s857_s4 = scalar_lea.vmem %s447_s3, 128  ;;  %p862_p3 = scmp.lt.s32.totalorder %s447_s3, %s447_s3 }
 0x26e   :  { %p858_p2 = scmp.ne.s32.totalorder %s447_s3, %s857_s4  ;;  %p863_p4 = scmp.lt.s32.totalorder %s857_s4, %s857_s4 }
 0x270   :  { %p864_p5 = por %p863_p4, %p862_p3 }
 0x272   :  { %p865_p6 = pnand %p864_p5, %p858_p2 }
 0x2ef   :  { %v428_v20 = vpop.xlane.xlu0 %427 }
 0x2f0   :  { %v436_v21 = vadd.f32 %v477_v19, %v428_v20 }
 0x2f2   :  { %438 = vst.msk [vmem:[#allocation17] sm:$0xff] %vm437_vm2, %v436_v21 }
 0x2f3   :  { %868 = shalt.err (!%p865_p6)
}
 0x2f4   :  { %s869_s23 = scalar_lea.hbm %s1116_s9, 128 }
 0x2f5   :  { %p870_p7 = scmp.ne.s32.totalorder %s1116_s9, %s869_s23  ;;  %p873_p8 = scmp.lt.u32.totalorder %s869_s23, %s1116_s9 }
 0x2f7   :  { %p875_p9 = pnand %p873_p8, %p870_p7 }
 0x2f9   :  { %878 = shalt.err (!%p875_p9)
}
 0x2fa   :  { %449 = dma.vmem_to_hbm [thread:$0]  %s447_s3, 128, %s1116_s9, [#allocation5]  }
 0x2fb   :  { %889 = dma.done.wait [#allocation5], 128  }
 0x2fc   :  { %890 = vsyncadd [#allocation5], 4294967168 }
 0x2fd   :  { %891 = dma.done.wait [#allocation19], 128  }
 0x2fe   :  { %892 = vsyncadd [#allocation19], 4294967168 }
 0x2ff   :  { %466 = vsyncpa [#allocation4], 1 }
 0x300   :  { %467 = vsyncpa [#allocation7], 1 }
 0x301   :  { %468 = vsyncpa [#allocation10], 1 }
 0x302   :  { %469 = vsyncpa [#allocation13], 1 }
 0x303   :  { %470 = vsyncpa [#allocation16], 1 }
 0x304   :  { %471 = vsyncpa [#allocation5], 1 }
 0x305   :  { %472 = vsyncpa [#allocation19], 1 }

</bundles_post_ra>
